<compile_context>
chip_gen: v7x
topology: tpu7x:2x2x1
jax: 0.10.0
libtpu: 0.0.40
codegen_flags: <defaults>
</compile_context>

<pallas_src>
import functools
import math

import numpy as np

import jax
import jax.numpy as jnp
from jax import lax
from jax.experimental import pallas as pl
from jax.experimental.pallas import tpu as pltpu


_INV_SQRT2 = 1.0 / math.sqrt(2.0)


def _gelu_exact(v):
    # torch.nn.GELU() default (approximate='none'): exact erf form.
    return 0.5 * v * (1.0 + lax.erf(v * _INV_SQRT2))


def _resblock_kernel(x_ref, mask_ref, dww_ref, dwb_ref, ga_ref, gw_ref, gb_ref,
                     w1_ref, b1_ref, w2_ref, b2_ref, o_ref, *, W, eps):
    """One image per grid step. Layout: channels-first (C, H*W); lanes = H*W."""
    C, HW = x_ref.shape[1], x_ref.shape[2]
    x = x_ref[0].astype(jnp.float32)                      # (C, HW)

    # ---- depthwise 3x3 conv: 9 taps = masked lane-rolls (XLU) + FMAs (VPU) ----
    acc = x * dww_ref[4].astype(jnp.float32)              # center tap (dh=0,dw=0): no mask
    tap = 0
    for dh in (-1, 0, 1):
        for dw in (-1, 0, 1):
            if dh == 0 and dw == 0:
                tap += 1
                continue
            d = dh * W + dw                                # flattened spatial shift
            shifted = pltpu.roll(x, (-d) % HW, 1)          # shifted[p] = x[p + d] (circular)
            m = mask_ref[tap]                              # (1, HW) zero at the wrapped border
            wt = dww_ref[tap].astype(jnp.float32)          # (C, 1) per-channel tap weight
            acc = acc + (shifted * m) * wt
            tap += 1
    acc = acc + dwb_ref[...].astype(jnp.float32)           # conv bias (C, 1)

    # ---- GroupNorm over (channels-in-group, H, W), eps inside rsqrt, then ReLU ----
    ga = ga_ref[...].astype(jnp.float32)                   # (C, C) group-average matrix
    mean = jnp.sum(jnp.dot(ga, acc, preferred_element_type=jnp.float32),
                   axis=1, keepdims=True)                  # (C, 1) per-group mean
    cen = acc - mean
    var = jnp.sum(jnp.dot(ga, cen * cen, preferred_element_type=jnp.float32),
                  axis=1, keepdims=True)                   # (C, 1) biased variance
    scale = lax.rsqrt(var + eps) * gw_ref[...].astype(jnp.float32)
    y = jnp.maximum(cen * scale + gb_ref[...].astype(jnp.float32), 0.0)   # ReLU

    # ---- pointwise MLP (channels-first): Linear(C->2C)+GELU, Linear(2C->C)+GELU ----
    h = jnp.dot(w1_ref[...].astype(jnp.float32), y,
                preferred_element_type=jnp.float32) + b1_ref[...].astype(jnp.float32)
    h = _gelu_exact(h)
    z = jnp.dot(w2_ref[...].astype(jnp.float32), h,
                preferred_element_type=jnp.float32) + b2_ref[...].astype(jnp.float32)
    z = _gelu_exact(z)

    # ---- residual + final ReLU (lane-dense store: minor dim is H*W) ----
    o_ref[0] = jnp.maximum(x + z, 0.0).astype(o_ref.dtype)


def residual_block(x_nchw, params, num_groups, eps=1e-5):
    """ResidualBlock forward (stride=1, norm_fn='group'). x_nchw: (N,C,H,W) f32."""
    N, C, H, W = x_nchw.shape
    HW = H * W
    C2 = 2 * C

    # Native NCHW storage -> (N, C, H*W): a free, layout-preserving reshape.
    x2 = x_nchw.reshape(N, C, HW)

    # Depthwise conv weights reordered to (9 taps, C, 1); tap t = (dh+1)*3 + (dw+1).
    conv_w = params["conv_w"]                                   # (C, 3, 3)
    dww = jnp.transpose(conv_w, (1, 2, 0)).reshape(9, C, 1)
    dwb = params["conv_b"].reshape(C, 1)
    gw = params["gn_w"].reshape(C, 1)
    gb = params["gn_b"].reshape(C, 1)
    w1 = params["w1"]                                           # (2C, C)  torch Linear layout
    b1 = params["b1"].reshape(C2, 1)
    w2 = params["w2"]                                           # (C, 2C)
    b2 = params["b2"].reshape(C, 1)

    # Precomputed border masks for the 9 conv taps (compile-time numpy constants).
    hh = np.arange(H)[:, None]
    ww = np.arange(W)[None, :]
    mask_list = []
    for dh in (-1, 0, 1):
        for dw in (-1, 0, 1):
            ok = ((hh + dh >= 0) & (hh + dh < H) &
                  (ww + dw >= 0) & (ww + dw < W)).astype(np.float32)
            mask_list.append(ok.reshape(1, HW))
    masks = jnp.asarray(np.stack(mask_list, axis=0))            # (9, 1, HW)

    # Group-averaging matrix: A[i,j] = 1/(group_size*HW) if same group else 0.
    gs = C // num_groups
    gid = np.arange(C) // gs
    ga = jnp.asarray((gid[:, None] == gid[None, :]).astype(np.float32) / (gs * HW))

    kernel = functools.partial(_resblock_kernel, W=W, eps=eps)

    flops = N * HW * (18 * C + 12 * C * C + 40 * C)
    transcendentals = 3 * N * C * HW
    bytes_accessed = 4 * (2 * N * C * HW + 9 * HW + 6 * C * C + 16 * C)
    cost = pl.CostEstimate(flops=flops, transcendentals=transcendentals,
                           bytes_accessed=bytes_accessed)

    out = pl.pallas_call(
        kernel,
        out_shape=jax.ShapeDtypeStruct((N, C, HW), x_nchw.dtype),
        grid_spec=pltpu.PrefetchScalarGridSpec(
            num_scalar_prefetch=0,
            grid=(N,),
            in_specs=[
                pl.BlockSpec((1, C, HW), lambda n: (n, 0, 0)),   # activation (single stream)
                pl.BlockSpec((9, 1, HW), lambda n: (0, 0, 0)),   # conv border masks
                pl.BlockSpec((9, C, 1), lambda n: (0, 0, 0)),    # dw conv taps
                pl.BlockSpec((C, 1), lambda n: (0, 0)),          # dw conv bias
                pl.BlockSpec((C, C), lambda n: (0, 0)),          # group-average matrix
                pl.BlockSpec((C, 1), lambda n: (0, 0)),          # GroupNorm weight
                pl.BlockSpec((C, 1), lambda n: (0, 0)),          # GroupNorm bias
                pl.BlockSpec((C2, C), lambda n: (0, 0)),         # Linear1 weight (2C, C)
                pl.BlockSpec((C2, 1), lambda n: (0, 0)),         # Linear1 bias
                pl.BlockSpec((C, C2), lambda n: (0, 0)),         # Linear2 weight (C, 2C)
                pl.BlockSpec((C, 1), lambda n: (0, 0)),          # Linear2 bias
            ],
            out_specs=pl.BlockSpec((1, C, HW), lambda n: (n, 0, 0)),
        ),
        compiler_params=pltpu.CompilerParams(
            dimension_semantics=("parallel",),
            vmem_limit_bytes=32 * 1024 * 1024,                   # safe on v5e/v6e/v7x
        ),
        cost_estimate=cost,
    )(x2, masks, dww, dwb, ga, gw, gb, w1, b1, w2, b2)

    return out.reshape(N, C, H, W)


def reference(x, params, num_groups, eps=1e-5):
    """Pure-JAX reference of ResidualBlock.forward (stride=1, norm_fn='group')."""
    N, C, H, W = x.shape
    conv_w = params["conv_w"].reshape(C, 1, 3, 3)                # OIHW, groups=C
    y = lax.conv_general_dilated(
        x, conv_w, window_strides=(1, 1), padding=((1, 1), (1, 1)),
        dimension_numbers=("NCHW", "OIHW", "NCHW"), feature_group_count=C)
    y = y + params["conv_b"].reshape(1, C, 1, 1)
    G = num_groups
    yr = y.reshape(N, G, C // G, H, W)
    mu = yr.mean(axis=(2, 3, 4), keepdims=True)
    var = ((yr - mu) ** 2).mean(axis=(2, 3, 4), keepdims=True)
    yn = ((yr - mu) / jnp.sqrt(var + eps)).reshape(N, C, H, W)
    yn = yn * params["gn_w"].reshape(1, C, 1, 1) + params["gn_b"].reshape(1, C, 1, 1)
    y = jnp.maximum(yn, 0.0)
    t = jnp.transpose(y, (0, 2, 3, 1))                           # NHWC
    h = t @ params["w1"].T + params["b1"]
    h = 0.5 * h * (1.0 + lax.erf(h * _INV_SQRT2))
    z = h @ params["w2"].T + params["b2"]
    z = 0.5 * z * (1.0 + lax.erf(z * _INV_SQRT2))
    z = jnp.transpose(z, (0, 3, 1, 2))                           # NCHW
    return jnp.maximum(x + z, 0.0)


if __name__ == "__main__":
    # in_planes == planes == 8 (groups=planes requires it); num_groups = planes // 8 = 1
    N, C, H, W = 2, 8, 16, 16
    num_groups = C // 8

    key = jax.random.PRNGKey(0)
    ks = jax.random.split(key, 9)
    x = jax.random.normal(ks[0], (N, C, H, W), jnp.float32)

    params = {
        "conv_w": jax.random.normal(ks[1], (C, 3, 3), jnp.float32) * 0.2,   # Conv2d weight (C,1,3,3) squeezed
        "conv_b": jax.random.normal(ks[2], (C,), jnp.float32) * 0.1,
        "gn_w": 1.0 + 0.1 * jax.random.normal(ks[3], (C,), jnp.float32),
        "gn_b": 0.1 * jax.random.normal(ks[4], (C,), jnp.float32),
        "w1": jax.random.normal(ks[5], (2 * C, C), jnp.float32) * 0.2,      # Linear(C, 2C).weight
        "b1": jax.random.normal(ks[6], (2 * C,), jnp.float32) * 0.1,
        "w2": jax.random.normal(ks[7], (C, 2 * C), jnp.float32) * 0.2,      # Linear(2C, C).weight
        "b2": jax.random.normal(ks[8], (C,), jnp.float32) * 0.1,
    }

    out = jax.block_until_ready(residual_block(x, params, num_groups))
    ref = jax.block_until_ready(reference(x, params, num_groups))

    assert out.shape == x.shape and out.dtype == x.dtype
    max_err = float(jnp.max(jnp.abs(out - ref)))
    assert max_err < 1e-4, f"max abs err {max_err}"
    print("KERNEL_OK")
</pallas_src>

<mosaic_0001>
module attributes {stable_mosaic.version = 11 : i64} {
  func.func @_resblock_kernel(%arg0: i32, %arg1: memref<1x8x256xf32, #tpu.memory_space<vmem>>, %arg2: memref<9x1x256xf32, #tpu.memory_space<vmem>>, %arg3: memref<9x8x1xf32, #tpu.memory_space<vmem>>, %arg4: memref<8x1xf32, #tpu.memory_space<vmem>>, %arg5: memref<8x8xf32, #tpu.memory_space<vmem>>, %arg6: memref<8x1xf32, #tpu.memory_space<vmem>>, %arg7: memref<8x1xf32, #tpu.memory_space<vmem>>, %arg8: memref<16x8xf32, #tpu.memory_space<vmem>>, %arg9: memref<16x1xf32, #tpu.memory_space<vmem>>, %arg10: memref<8x16xf32, #tpu.memory_space<vmem>>, %arg11: memref<8x1xf32, #tpu.memory_space<vmem>>, %arg12: memref<1x8x256xf32, #tpu.memory_space<vmem>>) attributes {dimension_semantics = [#tpu.dimension_semantics<parallel>], iteration_bounds = array<i64: 2>, scalar_prefetch = 0 : i64, scratch_operands = 0 : i64, tpu.core_type = #tpu.core_type<tc>, window_params = [{transform_indices = @transform_0, window_bounds = array<i64: 1, 8, 256>}, {pipeline_mode = #tpu.pipeline_mode<synchronous>, transform_indices = @transform_1, window_bounds = array<i64: 9, 1, 256>}, {pipeline_mode = #tpu.pipeline_mode<synchronous>, transform_indices = @transform_2, window_bounds = array<i64: 9, 8, 1>}, {pipeline_mode = #tpu.pipeline_mode<synchronous>, transform_indices = @transform_3, window_bounds = array<i64: 8, 1>}, {pipeline_mode = #tpu.pipeline_mode<synchronous>, transform_indices = @transform_4, window_bounds = array<i64: 8, 8>}, {pipeline_mode = #tpu.pipeline_mode<synchronous>, transform_indices = @transform_5, window_bounds = array<i64: 8, 1>}, {pipeline_mode = #tpu.pipeline_mode<synchronous>, transform_indices = @transform_6, window_bounds = array<i64: 8, 1>}, {pipeline_mode = #tpu.pipeline_mode<synchronous>, transform_indices = @transform_7, window_bounds = array<i64: 16, 8>}, {pipeline_mode = #tpu.pipeline_mode<synchronous>, transform_indices = @transform_8, window_bounds = array<i64: 16, 1>}, {pipeline_mode = #tpu.pipeline_mode<synchronous>, transform_indices = @transform_9, window_bounds = array<i64: 8, 16>}, {pipeline_mode = #tpu.pipeline_mode<synchronous>, transform_indices = @transform_10, window_bounds = array<i64: 8, 1>}, {transform_indices = @transform_11, window_bounds = array<i64: 1, 8, 256>}]} {
    %c0 = arith.constant 0 : index
    %c0_0 = arith.constant 0 : index
    %c0_1 = arith.constant 0 : index
    %0 = vector.load %arg1[%c0, %c0_0, %c0_1] : memref<1x8x256xf32, #tpu.memory_space<vmem>>, vector<1x8x256xf32>
    %1 = vector.shape_cast %0 : vector<1x8x256xf32> to vector<8x256xf32>
    %c4 = arith.constant 4 : index
    %c0_2 = arith.constant 0 : index
    %c0_3 = arith.constant 0 : index
    %2 = vector.load %arg3[%c4, %c0_2, %c0_3] : memref<9x8x1xf32, #tpu.memory_space<vmem>>, vector<1x8x1xf32>
    %3 = vector.shape_cast %2 : vector<1x8x1xf32> to vector<8x1xf32>
    %4 = vector.broadcast %3 : vector<8x1xf32> to vector<8x256xf32>
    %5 = arith.mulf %1, %4 : vector<8x256xf32>
    %c17_i32 = arith.constant 17 : i32
    %6 = tpu.dynamic_rotate %1 by %c17_i32 dim 1 : vector<8x256xf32>, i32 -> vector<8x256xf32>
    %c0_4 = arith.constant 0 : index
    %c0_5 = arith.constant 0 : index
    %c0_6 = arith.constant 0 : index
    %7 = vector.load %arg2[%c0_4, %c0_5, %c0_6] : memref<9x1x256xf32, #tpu.memory_space<vmem>>, vector<1x1x256xf32>
    %8 = vector.shape_cast %7 : vector<1x1x256xf32> to vector<1x256xf32>
    %c0_7 = arith.constant 0 : index
    %c0_8 = arith.constant 0 : index
    %c0_9 = arith.constant 0 : index
    %9 = vector.load %arg3[%c0_7, %c0_8, %c0_9] : memref<9x8x1xf32, #tpu.memory_space<vmem>>, vector<1x8x1xf32>
    %10 = vector.shape_cast %9 : vector<1x8x1xf32> to vector<8x1xf32>
    %11 = vector.broadcast %8 : vector<1x256xf32> to vector<8x256xf32>
    %12 = arith.mulf %6, %11 : vector<8x256xf32>
    %13 = vector.broadcast %10 : vector<8x1xf32> to vector<8x256xf32>
    %14 = arith.mulf %12, %13 : vector<8x256xf32>
    %15 = arith.addf %5, %14 : vector<8x256xf32>
    %c16_i32 = arith.constant 16 : i32
    %16 = tpu.dynamic_rotate %1 by %c16_i32 dim 1 : vector<8x256xf32>, i32 -> vector<8x256xf32>
    %c1 = arith.constant 1 : index
    %c0_10 = arith.constant 0 : index
    %c0_11 = arith.constant 0 : index
    %17 = vector.load %arg2[%c1, %c0_10, %c0_11] : memref<9x1x256xf32, #tpu.memory_space<vmem>>, vector<1x1x256xf32>
    %18 = vector.shape_cast %17 : vector<1x1x256xf32> to vector<1x256xf32>
    %c1_12 = arith.constant 1 : index
    %c0_13 = arith.constant 0 : index
    %c0_14 = arith.constant 0 : index
    %19 = vector.load %arg3[%c1_12, %c0_13, %c0_14] : memref<9x8x1xf32, #tpu.memory_space<vmem>>, vector<1x8x1xf32>
    %20 = vector.shape_cast %19 : vector<1x8x1xf32> to vector<8x1xf32>
    %21 = vector.broadcast %18 : vector<1x256xf32> to vector<8x256xf32>
    %22 = arith.mulf %16, %21 : vector<8x256xf32>
    %23 = vector.broadcast %20 : vector<8x1xf32> to vector<8x256xf32>
    %24 = arith.mulf %22, %23 : vector<8x256xf32>
    %25 = arith.addf %15, %24 : vector<8x256xf32>
    %c15_i32 = arith.constant 15 : i32
    %26 = tpu.dynamic_rotate %1 by %c15_i32 dim 1 : vector<8x256xf32>, i32 -> vector<8x256xf32>
    %c2 = arith.constant 2 : index
    %c0_15 = arith.constant 0 : index
    %c0_16 = arith.constant 0 : index
    %27 = vector.load %arg2[%c2, %c0_15, %c0_16] : memref<9x1x256xf32, #tpu.memory_space<vmem>>, vector<1x1x256xf32>
    %28 = vector.shape_cast %27 : vector<1x1x256xf32> to vector<1x256xf32>
    %c2_17 = arith.constant 2 : index
    %c0_18 = arith.constant 0 : index
    %c0_19 = arith.constant 0 : index
    %29 = vector.load %arg3[%c2_17, %c0_18, %c0_19] : memref<9x8x1xf32, #tpu.memory_space<vmem>>, vector<1x8x1xf32>
    %30 = vector.shape_cast %29 : vector<1x8x1xf32> to vector<8x1xf32>
    %31 = vector.broadcast %28 : vector<1x256xf32> to vector<8x256xf32>
    %32 = arith.mulf %26, %31 : vector<8x256xf32>
    %33 = vector.broadcast %30 : vector<8x1xf32> to vector<8x256xf32>
    %34 = arith.mulf %32, %33 : vector<8x256xf32>
    %35 = arith.addf %25, %34 : vector<8x256xf32>
    %c1_i32 = arith.constant 1 : i32
    %36 = tpu.dynamic_rotate %1 by %c1_i32 dim 1 : vector<8x256xf32>, i32 -> vector<8x256xf32>
    %c3 = arith.constant 3 : index
    %c0_20 = arith.constant 0 : index
    %c0_21 = arith.constant 0 : index
    %37 = vector.load %arg2[%c3, %c0_20, %c0_21] : memref<9x1x256xf32, #tpu.memory_space<vmem>>, vector<1x1x256xf32>
    %38 = vector.shape_cast %37 : vector<1x1x256xf32> to vector<1x256xf32>
    %c3_22 = arith.constant 3 : index
    %c0_23 = arith.constant 0 : index
    %c0_24 = arith.constant 0 : index
    %39 = vector.load %arg3[%c3_22, %c0_23, %c0_24] : memref<9x8x1xf32, #tpu.memory_space<vmem>>, vector<1x8x1xf32>
    %40 = vector.shape_cast %39 : vector<1x8x1xf32> to vector<8x1xf32>
    %41 = vector.broadcast %38 : vector<1x256xf32> to vector<8x256xf32>
    %42 = arith.mulf %36, %41 : vector<8x256xf32>
    %43 = vector.broadcast %40 : vector<8x1xf32> to vector<8x256xf32>
    %44 = arith.mulf %42, %43 : vector<8x256xf32>
    %45 = arith.addf %35, %44 : vector<8x256xf32>
    %c255_i32 = arith.constant 255 : i32
    %46 = tpu.dynamic_rotate %1 by %c255_i32 dim 1 : vector<8x256xf32>, i32 -> vector<8x256xf32>
    %c5 = arith.constant 5 : index
    %c0_25 = arith.constant 0 : index
    %c0_26 = arith.constant 0 : index
    %47 = vector.load %arg2[%c5, %c0_25, %c0_26] : memref<9x1x256xf32, #tpu.memory_space<vmem>>, vector<1x1x256xf32>
    %48 = vector.shape_cast %47 : vector<1x1x256xf32> to vector<1x256xf32>
    %c5_27 = arith.constant 5 : index
    %c0_28 = arith.constant 0 : index
    %c0_29 = arith.constant 0 : index
    %49 = vector.load %arg3[%c5_27, %c0_28, %c0_29] : memref<9x8x1xf32, #tpu.memory_space<vmem>>, vector<1x8x1xf32>
    %50 = vector.shape_cast %49 : vector<1x8x1xf32> to vector<8x1xf32>
    %51 = vector.broadcast %48 : vector<1x256xf32> to vector<8x256xf32>
    %52 = arith.mulf %46, %51 : vector<8x256xf32>
    %53 = vector.broadcast %50 : vector<8x1xf32> to vector<8x256xf32>
    %54 = arith.mulf %52, %53 : vector<8x256xf32>
    %55 = arith.addf %45, %54 : vector<8x256xf32>
    %c241_i32 = arith.constant 241 : i32
    %56 = tpu.dynamic_rotate %1 by %c241_i32 dim 1 : vector<8x256xf32>, i32 -> vector<8x256xf32>
    %c6 = arith.constant 6 : index
    %c0_30 = arith.constant 0 : index
    %c0_31 = arith.constant 0 : index
    %57 = vector.load %arg2[%c6, %c0_30, %c0_31] : memref<9x1x256xf32, #tpu.memory_space<vmem>>, vector<1x1x256xf32>
    %58 = vector.shape_cast %57 : vector<1x1x256xf32> to vector<1x256xf32>
    %c6_32 = arith.constant 6 : index
    %c0_33 = arith.constant 0 : index
    %c0_34 = arith.constant 0 : index
    %59 = vector.load %arg3[%c6_32, %c0_33, %c0_34] : memref<9x8x1xf32, #tpu.memory_space<vmem>>, vector<1x8x1xf32>
    %60 = vector.shape_cast %59 : vector<1x8x1xf32> to vector<8x1xf32>
    %61 = vector.broadcast %58 : vector<1x256xf32> to vector<8x256xf32>
    %62 = arith.mulf %56, %61 : vector<8x256xf32>
    %63 = vector.broadcast %60 : vector<8x1xf32> to vector<8x256xf32>
    %64 = arith.mulf %62, %63 : vector<8x256xf32>
    %65 = arith.addf %55, %64 : vector<8x256xf32>
    %c240_i32 = arith.constant 240 : i32
    %66 = tpu.dynamic_rotate %1 by %c240_i32 dim 1 : vector<8x256xf32>, i32 -> vector<8x256xf32>
    %c7 = arith.constant 7 : index
    %c0_35 = arith.constant 0 : index
    %c0_36 = arith.constant 0 : index
    %67 = vector.load %arg2[%c7, %c0_35, %c0_36] : memref<9x1x256xf32, #tpu.memory_space<vmem>>, vector<1x1x256xf32>
    %68 = vector.shape_cast %67 : vector<1x1x256xf32> to vector<1x256xf32>
    %c7_37 = arith.constant 7 : index
    %c0_38 = arith.constant 0 : index
    %c0_39 = arith.constant 0 : index
    %69 = vector.load %arg3[%c7_37, %c0_38, %c0_39] : memref<9x8x1xf32, #tpu.memory_space<vmem>>, vector<1x8x1xf32>
    %70 = vector.shape_cast %69 : vector<1x8x1xf32> to vector<8x1xf32>
    %71 = vector.broadcast %68 : vector<1x256xf32> to vector<8x256xf32>
    %72 = arith.mulf %66, %71 : vector<8x256xf32>
    %73 = vector.broadcast %70 : vector<8x1xf32> to vector<8x256xf32>
    %74 = arith.mulf %72, %73 : vector<8x256xf32>
    %75 = arith.addf %65, %74 : vector<8x256xf32>
    %c239_i32 = arith.constant 239 : i32
    %76 = tpu.dynamic_rotate %1 by %c239_i32 dim 1 : vector<8x256xf32>, i32 -> vector<8x256xf32>
    %c8 = arith.constant 8 : index
    %c0_40 = arith.constant 0 : index
    %c0_41 = arith.constant 0 : index
    %77 = vector.load %arg2[%c8, %c0_40, %c0_41] : memref<9x1x256xf32, #tpu.memory_space<vmem>>, vector<1x1x256xf32>
    %78 = vector.shape_cast %77 : vector<1x1x256xf32> to vector<1x256xf32>
    %c8_42 = arith.constant 8 : index
    %c0_43 = arith.constant 0 : index
    %c0_44 = arith.constant 0 : index
    %79 = vector.load %arg3[%c8_42, %c0_43, %c0_44] : memref<9x8x1xf32, #tpu.memory_space<vmem>>, vector<1x8x1xf32>
    %80 = vector.shape_cast %79 : vector<1x8x1xf32> to vector<8x1xf32>
    %81 = vector.broadcast %78 : vector<1x256xf32> to vector<8x256xf32>
    %82 = arith.mulf %76, %81 : vector<8x256xf32>
    %83 = vector.broadcast %80 : vector<8x1xf32> to vector<8x256xf32>
    %84 = arith.mulf %82, %83 : vector<8x256xf32>
    %85 = arith.addf %75, %84 : vector<8x256xf32>
    %c0_45 = arith.constant 0 : index
    %c0_46 = arith.constant 0 : index
    %86 = vector.load %arg4[%c0_45, %c0_46] : memref<8x1xf32, #tpu.memory_space<vmem>>, vector<8x1xf32>
    %87 = vector.broadcast %86 : vector<8x1xf32> to vector<8x256xf32>
    %88 = arith.addf %85, %87 : vector<8x256xf32>
    %c0_47 = arith.constant 0 : index
    %c0_48 = arith.constant 0 : index
    %89 = vector.load %arg5[%c0_47, %c0_48] : memref<8x8xf32, #tpu.memory_space<vmem>>, vector<8x8xf32>
    %cst = arith.constant dense<0.000000e+00> : vector<8x256xf32>
    %90 = tpu.matmul %89, %88, %cst {dimension_numbers = #tpu.dot_dimension_numbers<[1], [0], [0], [1], [0, 0, 1, 1], [], []>} : vector<8x8xf32>, vector<8x256xf32>, vector<8x256xf32> -> vector<8x256xf32>
    %cst_49 = arith.constant dense<0.000000e+00> : vector<8xf32>
    %91 = vector.multi_reduction <add>, %90, %cst_49 [1] : vector<8x256xf32> to vector<8xf32>
    %92 = vector.shape_cast %91 : vector<8xf32> to vector<8x1xf32>
    %93 = vector.broadcast %92 : vector<8x1xf32> to vector<8x256xf32>
    %94 = arith.subf %88, %93 : vector<8x256xf32>
    %95 = arith.mulf %94, %94 : vector<8x256xf32>
    %cst_50 = arith.constant dense<0.000000e+00> : vector<8x256xf32>
    %96 = tpu.matmul %89, %95, %cst_50 {dimension_numbers = #tpu.dot_dimension_numbers<[1], [0], [0], [1], [0, 0, 1, 1], [], []>} : vector<8x8xf32>, vector<8x256xf32>, vector<8x256xf32> -> vector<8x256xf32>
    %cst_51 = arith.constant dense<0.000000e+00> : vector<8xf32>
    %97 = vector.multi_reduction <add>, %96, %cst_51 [1] : vector<8x256xf32> to vector<8xf32>
    %98 = vector.shape_cast %97 : vector<8xf32> to vector<8x1xf32>
    %cst_52 = arith.constant 9.99999974E-6 : f32
    %99 = vector.broadcast %cst_52 : f32 to vector<8x1xf32>
    %100 = arith.addf %98, %99 : vector<8x1xf32>
    %101 = math.rsqrt %100 : vector<8x1xf32>
    %c0_53 = arith.constant 0 : index
    %c0_54 = arith.constant 0 : index
    %102 = vector.load %arg6[%c0_53, %c0_54] : memref<8x1xf32, #tpu.memory_space<vmem>>, vector<8x1xf32>
    %103 = arith.mulf %101, %102 : vector<8x1xf32>
    %104 = vector.broadcast %103 : vector<8x1xf32> to vector<8x256xf32>
    %105 = arith.mulf %94, %104 : vector<8x256xf32>
    %c0_55 = arith.constant 0 : index
    %c0_56 = arith.constant 0 : index
    %106 = vector.load %arg7[%c0_55, %c0_56] : memref<8x1xf32, #tpu.memory_space<vmem>>, vector<8x1xf32>
    %107 = vector.broadcast %106 : vector<8x1xf32> to vector<8x256xf32>
    %108 = arith.addf %105, %107 : vector<8x256xf32>
    %cst_57 = arith.constant 0.000000e+00 : f32
    %109 = vector.broadcast %cst_57 : f32 to vector<8x256xf32>
    %110 = arith.maximumf %108, %109 : vector<8x256xf32>
    %c0_58 = arith.constant 0 : index
    %c0_59 = arith.constant 0 : index
    %111 = vector.load %arg8[%c0_58, %c0_59] : memref<16x8xf32, #tpu.memory_space<vmem>>, vector<16x8xf32>
    %cst_60 = arith.constant dense<0.000000e+00> : vector<16x256xf32>
    %112 = tpu.matmul %111, %110, %cst_60 {dimension_numbers = #tpu.dot_dimension_numbers<[1], [0], [0], [1], [0, 0, 1, 1], [], []>} : vector<16x8xf32>, vector<8x256xf32>, vector<16x256xf32> -> vector<16x256xf32>
    %c0_61 = arith.constant 0 : index
    %c0_62 = arith.constant 0 : index
    %113 = vector.load %arg9[%c0_61, %c0_62] : memref<16x1xf32, #tpu.memory_space<vmem>>, vector<16x1xf32>
    %114 = vector.broadcast %113 : vector<16x1xf32> to vector<16x256xf32>
    %115 = arith.addf %112, %114 : vector<16x256xf32>
    %cst_63 = arith.constant 5.000000e-01 : f32
    %116 = vector.broadcast %cst_63 : f32 to vector<16x256xf32>
    %117 = arith.mulf %116, %115 : vector<16x256xf32>
    %cst_64 = arith.constant 0.707106769 : f32
    %118 = vector.broadcast %cst_64 : f32 to vector<16x256xf32>
    %119 = arith.mulf %115, %118 : vector<16x256xf32>
    %120 = math.erf %119 : vector<16x256xf32>
    %cst_65 = arith.constant 1.000000e+00 : f32
    %121 = vector.broadcast %cst_65 : f32 to vector<16x256xf32>
    %122 = arith.addf %121, %120 : vector<16x256xf32>
    %123 = arith.mulf %117, %122 : vector<16x256xf32>
    %c0_66 = arith.constant 0 : index
    %c0_67 = arith.constant 0 : index
    %124 = vector.load %arg10[%c0_66, %c0_67] : memref<8x16xf32, #tpu.memory_space<vmem>>, vector<8x16xf32>
    %cst_68 = arith.constant dense<0.000000e+00> : vector<8x256xf32>
    %125 = tpu.matmul %124, %123, %cst_68 {dimension_numbers = #tpu.dot_dimension_numbers<[1], [0], [0], [1], [0, 0, 1, 1], [], []>} : vector<8x16xf32>, vector<16x256xf32>, vector<8x256xf32> -> vector<8x256xf32>
    %c0_69 = arith.constant 0 : index
    %c0_70 = arith.constant 0 : index
    %126 = vector.load %arg11[%c0_69, %c0_70] : memref<8x1xf32, #tpu.memory_space<vmem>>, vector<8x1xf32>
    %127 = vector.broadcast %126 : vector<8x1xf32> to vector<8x256xf32>
    %128 = arith.addf %125, %127 : vector<8x256xf32>
    %cst_71 = arith.constant 5.000000e-01 : f32
    %129 = vector.broadcast %cst_71 : f32 to vector<8x256xf32>
    %130 = arith.mulf %129, %128 : vector<8x256xf32>
    %cst_72 = arith.constant 0.707106769 : f32
    %131 = vector.broadcast %cst_72 : f32 to vector<8x256xf32>
    %132 = arith.mulf %128, %131 : vector<8x256xf32>
    %133 = math.erf %132 : vector<8x256xf32>
    %cst_73 = arith.constant 1.000000e+00 : f32
    %134 = vector.broadcast %cst_73 : f32 to vector<8x256xf32>
    %135 = arith.addf %134, %133 : vector<8x256xf32>
    %136 = arith.mulf %130, %135 : vector<8x256xf32>
    %137 = arith.addf %1, %136 : vector<8x256xf32>
    %cst_74 = arith.constant 0.000000e+00 : f32
    %138 = vector.broadcast %cst_74 : f32 to vector<8x256xf32>
    %139 = arith.maximumf %137, %138 : vector<8x256xf32>
    %c0_75 = arith.constant 0 : index
    %c0_76 = arith.constant 0 : index
    %c0_77 = arith.constant 0 : index
    %140 = vector.load %arg12[%c0_75, %c0_76, %c0_77] : memref<1x8x256xf32, #tpu.memory_space<vmem>>, vector<1x8x256xf32>
    %141 = vector.shape_cast %140 : vector<1x8x256xf32> to vector<8x256xf32>
    %142 = vector.shape_cast %139 : vector<8x256xf32> to vector<1x8x256xf32>
    tpu.vector_store %arg12[%c0_75, %c0_76, %c0_77], %142 {strides = array<i32>} : memref<1x8x256xf32, #tpu.memory_space<vmem>>, vector<1x8x256xf32>,
    return
  }
  func.func @transform_0(%arg0: i32) -> (i32, i32, i32) {
    %c0_i32 = arith.constant 0 : i32
    %c0_i32_0 = arith.constant 0 : i32
    %c0_i32_1 = arith.constant 0 : i32
    return %arg0, %c0_i32, %c0_i32_0 : i32, i32, i32
  }
  func.func @transform_1(%arg0: i32) -> (i32, i32, i32) {
    %c0_i32 = arith.constant 0 : i32
    %c0_i32_0 = arith.constant 0 : i32
    %c0_i32_1 = arith.constant 0 : i32
    %c0_i32_2 = arith.constant 0 : i32
    return %c0_i32, %c0_i32_0, %c0_i32_1 : i32, i32, i32
  }
  func.func @transform_2(%arg0: i32) -> (i32, i32, i32) {
    %c0_i32 = arith.constant 0 : i32
    %c0_i32_0 = arith.constant 0 : i32
    %c0_i32_1 = arith.constant 0 : i32
    %c0_i32_2 = arith.constant 0 : i32
    return %c0_i32, %c0_i32_0, %c0_i32_1 : i32, i32, i32
  }
  func.func @transform_3(%arg0: i32) -> (i32, i32) {
    %c0_i32 = arith.constant 0 : i32
    %c0_i32_0 = arith.constant 0 : i32
    %c0_i32_1 = arith.constant 0 : i32
    return %c0_i32, %c0_i32_0 : i32, i32
  }
  func.func @transform_4(%arg0: i32) -> (i32, i32) {
    %c0_i32 = arith.constant 0 : i32
    %c0_i32_0 = arith.constant 0 : i32
    %c0_i32_1 = arith.constant 0 : i32
    return %c0_i32, %c0_i32_0 : i32, i32
  }
  func.func @transform_5(%arg0: i32) -> (i32, i32) {
    %c0_i32 = arith.constant 0 : i32
    %c0_i32_0 = arith.constant 0 : i32
    %c0_i32_1 = arith.constant 0 : i32
    return %c0_i32, %c0_i32_0 : i32, i32
  }
  func.func @transform_6(%arg0: i32) -> (i32, i32) {
    %c0_i32 = arith.constant 0 : i32
    %c0_i32_0 = arith.constant 0 : i32
    %c0_i32_1 = arith.constant 0 : i32
    return %c0_i32, %c0_i32_0 : i32, i32
  }
  func.func @transform_7(%arg0: i32) -> (i32, i32) {
    %c0_i32 = arith.constant 0 : i32
    %c0_i32_0 = arith.constant 0 : i32
    %c0_i32_1 = arith.constant 0 : i32
    return %c0_i32, %c0_i32_0 : i32, i32
  }
  func.func @transform_8(%arg0: i32) -> (i32, i32) {
    %c0_i32 = arith.constant 0 : i32
    %c0_i32_0 = arith.constant 0 : i32
    %c0_i32_1 = arith.constant 0 : i32
    return %c0_i32, %c0_i32_0 : i32, i32
  }
  func.func @transform_9(%arg0: i32) -> (i32, i32) {
    %c0_i32 = arith.constant 0 : i32
    %c0_i32_0 = arith.constant 0 : i32
    %c0_i32_1 = arith.constant 0 : i32
    return %c0_i32, %c0_i32_0 : i32, i32
  }
  func.func @transform_10(%arg0: i32) -> (i32, i32) {
    %c0_i32 = arith.constant 0 : i32
    %c0_i32_0 = arith.constant 0 : i32
    %c0_i32_1 = arith.constant 0 : i32
    return %c0_i32, %c0_i32_0 : i32, i32
  }
  func.func @transform_11(%arg0: i32) -> (i32, i32, i32) {
    %c0_i32 = arith.constant 0 : i32
    %c0_i32_0 = arith.constant 0 : i32
    %c0_i32_1 = arith.constant 0 : i32
    return %arg0, %c0_i32, %c0_i32_0 : i32, i32, i32
  }
}

</mosaic_0001>

<bundles_post_ra>
// kernel: tpu_custom_call.1
= control target key start
LH: loop header
LB: loop body
LE: loop exit
PB: predicated region body
PF: predicated region fallthrough
CT: control target
= control target key end

     0   :  { %s1653_s0 = inlined_call_operand.vmem [shape: f32[2,8,256], index: 0, kind: input, shape index: {}]   ;;  %s1654_s1 = inlined_call_operand.vmem [shape: f32[9,1,256], index: 1, kind: input, shape index: {}]   ;;  %s1655_s2 = inlined_call_operand.vmem [shape: f32[9,8,1], index: 2, kind: input, shape index: {}]   ;;  %s1656_s3 = inlined_call_operand.vmem [shape: f32[8,1], index: 3, kind: input, shape index: {}]   ;;  %s1657_s4 = inlined_call_operand.vmem [shape: f32[8,8], index: 4, kind: input, shape index: {}]   ;;  %s1658_s5 = inlined_call_operand.vmem [shape: f32[8,1], index: 5, kind: input, shape index: {}]   ;;  %s1659_s6 = inlined_call_operand.vmem [shape: f32[8,1], index: 6, kind: input, shape index: {}]   ;;  %s1660_s7 = inlined_call_operand.vmem [shape: f32[16,8], index: 7, kind: input, shape index: {}]   ;;  %s1661_s8 = inlined_call_operand.vmem [shape: f32[16,1], index: 8, kind: input, shape index: {}]   ;;  %s1662_s9 = inlined_call_operand.vmem [shape: f32[8,16], index: 9, kind: input, shape index: {}]   ;;  %s1663_s10 = inlined_call_operand.vmem [shape: f32[8,1], index: 10, kind: input, shape index: {}]   ;;  %s1664_s11 = inlined_call_operand.hbm [shape: f32[2,8,256], index: 11, kind: output, shape index: {}]  }
   0x1   :  { %1665 = sst [smem:[#allocation5_spill]] %s1653_s0 }
   0x2   :  { %16 = vsyncpa [#allocation3], 0 }
   0x3   :  { %18 = vsyncpa [#allocation3 + $0x1], 0  ;;  %s1373_s17 = smov 0   ;;  %s1375_s18 = smov 0  }
   0x4   :  { %s1377_s19 = smov 0   ;;  %s1379_s20 = smov 0  }
   0x5 LB: > { %s1394_s21 = sadd.s32 4294967295, %s1300_s20   ;;  %s1135_s22 = sadd.s32 4294967294, %s1300_s20   ;;  %s1300_s20 = sphi %s1379_s20, %s1672_s20   ;;  %s1296_s19 = sphi %s1377_s19, %s1671_s19   ;;  %s1292_s18 = sphi %s1375_s18, %s1670_s18   ;;  %s1288_s17 = sphi %s1373_s17, %s1669_s17  }
   0x6   : > { %s1398_s23 = sadd.s32 1, %s1300_s20   ;;  %s267_s24 = sadd.s32 1, %s1296_s19 }
   0x7   : > { %s264_s25 = ssub.s32 %s1300_s20, %s1398_s23  ;;  %p277_p0 = scmp.ne.s32.totalorder %s1296_s19, %s1292_s18 }
   0x8   : > { %p265_p1 = scmp.eq.s32.totalorder %s264_s25, 0  ;;  %p278_p2 = scmp.eq.s32.totalorder %s1394_s21, 1 }
   0x9   : > { %p283_p3 = scmp.ne.s32.totalorder %s1292_s18, %s1288_s17  ;;  %p284_p4 = scmp.eq.s32.totalorder %s1135_s22, 1 }
   0xa   : > { %s1409_s26 = scalar_select %p265_p1, %s1296_s19, %s267_s24  }
   0xb   : > { %p1411_p5 = por %p278_p2, %p277_p0  ;;  %p1415_p6 = por %p284_p4, %p283_p3 }
   0xc   : > { %p1138_p7 = scmp.ge.s32.totalorder %s1300_s20, 1  ;;  %p340_p8 = scmp.lt.s32.totalorder %s1300_s20, 3 }
   0xe   : > { %p341_p9 = pnand %p1138_p7, %p340_p8 }
   0xf   : > { %v1144_v0 = vld [vmem:[%s1655_s2 + $0x8] sm:$0xff] (!%p341_p9)  ;;  %v1142_v1 = vld [vmem:[%s1655_s2 + $0x20] sm:$0xff] (!%p341_p9)  ;;  %p380_p10 = scmp.lt.s32.totalorder (!%p341_p9), %s1394_s21, 1  ;;  %v1302_v2 = vmov (!%p341_p9), 0   ;;  %s1668_s0 = sld [smem:[#allocation5_spill]] (!%p341_p9)  ;;  %v1146_v6 = vld [vmem:[%s1655_s2 + $0x10] sm:$0xff] (!%p341_p9)  ;;  %v400_v22 = vlaneseq (!%p341_p9) }
  0x10   : > { %344 = sbr.rel (%p341_p9) target bundleno = 1570 (0x622), region = 64  ;;  %1223 = vset.pattern.permute.xlu1 (!%p341_p9), %v1302_v2  ;;  %1222 = vset.pattern.permute.xlu0 (!%p341_p9), %v1302_v2  ;;  %v406_v3 = vld [vmem:[%s1655_s2] sm:$0xff] (!%p341_p9)  ;;  %s1303_s30 = smov (!%p341_p9), 17   ;;  %v1148_v7 = vld [vmem:[%s1655_s2 + $0x18] sm:$0xff] (!%p341_p9)  ;;  %v1150_v8 = vld [vmem:[%s1655_s2 + $0x28] sm:$0xff] (!%p341_p9)  ;;  %v1311_v13 = vmov (!%p341_p9), 0.0  }
  0x11   : > { %455 = vperm.xlu1 (!%p341_p9), %1223, %v1144_v0   ;;  %391 = vperm.xlu0 (!%p341_p9), %1222, %v1142_v1   ;;  %v1152_v9 = vld [vmem:[%s1655_s2 + $0x30] sm:$0xff] (!%p341_p9)  ;;  %s1307_s13 = smov (!%p341_p9), 127   ;;  %v1154_v10 = vld [vmem:[%s1655_s2 + $0x38] sm:$0xff] (!%p341_p9)  ;;  %s1308_s16 = smov (!%p341_p9), 113   ;;  %v1156_v11 = vld [vmem:[%s1655_s2 + $0x40] sm:$0xff] (!%p341_p9)  ;;  %v409_v25 = vshrl.u32 (!%p341_p9), %v400_v22, 7 }
  0x12   : > { %s1309_s25 = smov (!%p341_p9), 112   ;;  %v660_v12 = vld [vmem:[%s1656_s3] sm:$0xff] (!%p341_p9)  ;;  %737 = vmatprep.mubr.f32.mxu0 (!%p341_p9), %v1311_v13  ;;  %815 = vmatprep.mubr.f32.mxu1 (!%p341_p9), %v1311_v13  ;;  %v1484_v26 = vand.u32 (!%p341_p9), 127, %v400_v22  ;;  %v1149_v49 = vld [vmem:[%s1654_s1 + $0xa] sm:$0x3] (!%p341_p9)  ;;  %vm669_vm8 = vcmask (!%p341_p9), 64512  }
  0x13   : > { %v1488_v29 = vsub.s32 (!%p341_p9), 0, %v409_v25  ;;  %v1490_v30 = vsub.s32 (!%p341_p9), 1, %v409_v25  ;;  %v405_v31 = vld [vmem:[%s1654_s1] sm:$0x3] (!%p341_p9)  ;;  %v1143_v33 = vld [vmem:[%s1654_s1 + $0x2] sm:$0x3] (!%p341_p9) }
  0x14   : > { %vm402_vm0 = vcmp.lt.s32.totalorder (!%p341_p9), %v1484_v26, 17  ;;  %vm433_vm1 = vcmp.lt.s32.totalorder (!%p341_p9), %v1484_v26, 16  ;;  %v1145_v41 = vld [vmem:[%s1654_s1 + $0x4] sm:$0x3] (!%p341_p9)  ;;  %vm466_vm2 = vcmp.lt.s32.totalorder (!%p341_p9), %v1484_v26, 15  ;;  %vm499_vm3 = vcmp.lt.s32.totalorder (!%p341_p9), %v1484_v26, 1 }
  0x15   : > { %422 = vperm.xlu0 (!%p341_p9), %1222, %v406_v3   ;;  %v411_v35 = vrot.slane (!%p341_p9), %v405_v31, %v1488_v29  ;;  %v415_v36 = vrot.slane (!%p341_p9), %v405_v31, %v1490_v30  ;;  %v444_v39 = vrot.slane (!%p341_p9), %v1143_v33, %v1488_v29  ;;  %v448_v40 = vrot.slane (!%p341_p9), %v1143_v33, %v1490_v30  ;;  %v1147_v48 = vld [vmem:[%s1654_s1 + $0x6] sm:$0x3] (!%p341_p9) }
  0x16   : > { %v477_v50 = vrot.slane (!%p341_p9), %v1145_v41, %v1488_v29  ;;  %v481_v51 = vrot.slane (!%p341_p9), %v1145_v41, %v1490_v30  ;;  %v510_v57 = vrot.slane (!%p341_p9), %v1147_v48, %v1488_v29  ;;  %v514_v58 = vrot.slane (!%p341_p9), %v1147_v48, %v1490_v30 }
  0x17   : > { %s381_s14 = scalar_select %p380_p10, %s1394_s21, 1  ;;  %vm532_vm4 = vcmp.lt.s32.totalorder %v1484_v26, 127  ;;  %v543_v59 = vrot.slane %v1149_v49, %v1488_v29  ;;  %v547_v3 = vrot.slane %v1149_v49, %v1490_v30  ;;  %vm565_vm5 = vcmp.lt.s32.totalorder %v1484_v26, 113 }
  0x18   : > { %vm598_vm6 = vcmp.lt.s32.totalorder %v1484_v26, 112  ;;  %vm631_vm7 = vcmp.lt.s32.totalorder %v1484_v26, 111  ;;  %vm970_vm9 = vcmask 130048  }
  0x19   : > { %s1167_s22 = sshll.u32 %s381_s14, 4  ;;  %s1304_s14 = smov 16  }
  0x1a   : > { %s384_s29 = scalar_lea.vmem %s1668_s0, %s1167_s22  ;;  %s1305_s22 = smov 15  }
  0x1b   : > { %v1435_v4 = vld [vmem:[%s384_s29] sm:$0xff]  ;;  %v1438_v5 = vld [vmem:[%s384_s29 + $0x8] sm:$0xff]  ;;  %s1306_s29 = smov 1  }
  0x1c   : > { %396 = vrot.lane.b32.xlu1 %v1435_v4, %s1303_s30  ;;  %398 = vrot.lane.b32.xlu0 %v1438_v5, %s1303_s30 }
  0x20   : > { %488 = vperm.xlu1 %1223, %v1146_v6   ;;  %429 = vrot.lane.b32.xlu0 %v1435_v4, %s1304_s14  ;;  %v1151_v6 = vld [vmem:[%s1654_s1 + $0xc] sm:$0x3] }
  0x24   : > { %431 = vrot.lane.b32.xlu1 %v1438_v5, %s1304_s14  ;;  %521 = vperm.xlu0 %1222, %v1148_v7  }
  0x28   : > { %462 = vrot.lane.b32.xlu1 %v1435_v4, %s1305_s22  ;;  %464 = vrot.lane.b32.xlu0 %v1438_v5, %s1305_s22  ;;  %s377_s22 = sand.u32 1, %s1292_s18  }
  0x29   : > { %s1139_s24 = sshll.u32 %s377_s22, 4  ;;  %s1062_s15 = scalar_lea.sflag [#allocation3], %s377_s22 }
  0x2c   : > { %554 = vperm.xlu1 %1223, %v1150_v8   ;;  %495 = vrot.lane.b32.xlu0 %v1435_v4, %s1306_s29 }
  0x30   : > { %497 = vrot.lane.b32.xlu1 %v1438_v5, %s1306_s29  ;;  %587 = vperm.xlu0 %1222, %v1152_v9   ;;  %s1310_s29 = smov 111  }
  0x34   : > { %528 = vrot.lane.b32.xlu1 %v1435_v4, %s1307_s13  ;;  %530 = vrot.lane.b32.xlu0 %v1438_v5, %s1307_s13 }
  0x38   : > { %620 = vperm.xlu1 %1223, %v1154_v10   ;;  %561 = vrot.lane.b32.xlu0 %v1435_v4, %s1308_s16 }
  0x3c   : > { %563 = vrot.lane.b32.xlu1 %v1438_v5, %s1308_s16  ;;  %653 = vperm.xlu0 %1222, %v1156_v11   ;;  %s1312_s16 = smov [#allocation2]  }
  0x40   : > { %594 = vrot.lane.b32.xlu1 %v1435_v4, %s1309_s25  ;;  %596 = vrot.lane.b32.xlu0 %v1438_v5, %s1309_s25  ;;  %s1168_s25 = sshll.u32 %s1394_s21, 8 }
  0x41   : > { %s1611_s14 = scalar_lea.hbm %s1664_s11, %s1168_s25 }
  0x44   : > { %627 = vrot.lane.b32.xlu1 %v1435_v4, %s1310_s29  ;;  %629 = vrot.lane.b32.xlu0 %v1438_v5, %s1310_s29  ;;  %s379_s29 = scalar_lea.vmem [#allocation2], %s1139_s24  ;;  %s1242_s24 = sshll.u32 %s1312_s16, 4  ;;  %s1243_s24 = int_to_ptr.vmem [resolvable:$false] %s1242_s24 }
  0x45   : > { %s1076_s30 = sshll.u32 %s379_s29, 4  ;;  %s1244_s0 = scalar_lea.vmem %s1243_s24, 512  ;;  %s1613_s30 = int_to_ptr.vmem [resolvable:$true] %s1076_s30 }
  0x46   : > { %s1238_s21 = scalar_lea.vmem %s1613_s30, 256  ;;  %p1245_p0 = scmp.lt.s32.totalorder %s1613_s30, %s1243_s24 }
  0x47   : > { %p1239_p11 = scmp.ne.s32.totalorder %s1613_s30, %s1238_s21  ;;  %p1246_p1 = scmp.lt.s32.totalorder %s1244_s0, %s1238_s21 }
  0x48   : > { %663 = vperm.xlu1 %1223, %v660_v12  }
  0x49   : > { %p1240_p12 = pnand %p1239_p11, %p1411_p5  ;;  %p1247_p2 = por %p1246_p1, %p1245_p0 }
  0x4b   : > { %p1241_p13 = pneg %p1240_p12 }
  0x4d   : > { %p1248_p3 = pnand %p1247_p2, %p1241_p13 }
  0x90   : > { %v1478_v14 = vpop.permute.xlu1 %455  ;;  %v392_v15 = vpop.permute.xlu0 %391 }
  0x91   : > { %v394_v7 = vmul.f32 %v392_v15, %v1435_v4  ;;  %v395_v8 = vmul.f32 %v392_v15, %v1438_v5  ;;  %v580_v15 = vrot.slane %v1151_v6, %v1490_v30 }
  0x94   : > { %v423_v16 = vpop.permute.xlu0 %422  ;;  %v397_v17 = vpop.permute.xlu1 %396 }
  0x98   : > { %v399_v18 = vpop.permute.xlu0 %398 }
  0x99   : > { %v403_v37 = vsel %vm402_vm0, %v397_v17, %v399_v18  ;;  %v404_v38 = vsel %vm402_vm0, %v399_v18, %v397_v17 }
  0x9a   : > { %v418_v46 = vmul.f32 %v411_v35, %v404_v38  ;;  %v419_v47 = vmul.f32 %v415_v36, %v403_v37 }
  0x9c   : > { %v430_v20 = vpop.permute.xlu0 %429  ;;  %v425_v61 = vmul.f32 %v423_v16, %v418_v46  ;;  %v426_v62 = vmul.f32 %v423_v16, %v419_v47 }
  0x9e   : > { %v428_v22 = vadd.f32 %v426_v62, %v395_v8 }
  0x9f   : > { %v1480_v19 = vpop.permute.xlu1 %488 }
  0xa3   : > { %v432_v21 = vpop.permute.xlu1 %431  ;;  %v1482_v23 = vpop.permute.xlu0 %521 }
  0xa4   : > { %v434_v43 = vsel %vm433_vm1, %v430_v20, %v432_v21  ;;  %v435_v44 = vsel %vm433_vm1, %v432_v21, %v430_v20  ;;  %v427_v21 = vadd.f32 %v425_v61, %v394_v7 }
  0xa5   : > { %v451_v52 = vmul.f32 %v444_v39, %v435_v44  ;;  %v452_v53 = vmul.f32 %v448_v40, %v434_v43  ;;  %v1155_v39 = vld [vmem:[%s1654_s1 + $0x10] sm:$0x3] }
  0xa7   : > { %v463_v24 = vpop.permute.xlu1 %462  ;;  %v465_v27 = vpop.permute.xlu0 %464  ;;  %v458_v9 = vmul.f32 %v1478_v14, %v451_v52  ;;  %v459_v10 = vmul.f32 %v1478_v14, %v452_v53 }
  0xa8   : > { %v467_v54 = vsel %vm466_vm2, %v463_v24, %v465_v27  ;;  %v468_v55 = vsel %vm466_vm2, %v465_v27, %v463_v24  ;;  %v576_v24 = vrot.slane %v1151_v6, %v1488_v29 }
  0xa9   : > { %v484_v1 = vmul.f32 %v477_v50, %v468_v55  ;;  %v485_v2 = vmul.f32 %v481_v51, %v467_v54  ;;  %v460_v36 = vadd.f32 %v458_v9, %v427_v21  ;;  %v461_v37 = vadd.f32 %v459_v10, %v428_v22 }
  0xaa   : > { %v642_v50 = vrot.slane %v1155_v39, %v1488_v29  ;;  %v646_v51 = vrot.slane %v1155_v39, %v1490_v30  ;;  %v848_v39 = vld [vmem:[%s1661_s8] sm:$0xff] }
  0xab   : > { %v1486_v28 = vpop.permute.xlu1 %554  ;;  %v496_v32 = vpop.permute.xlu0 %495  ;;  %v491_v25 = vmul.f32 %v1480_v19, %v484_v1  ;;  %v492_v14 = vmul.f32 %v1480_v19, %v485_v2 }
  0xad   : > { %v493_v46 = vadd.f32 %v491_v25, %v460_v36  ;;  %v494_v47 = vadd.f32 %v492_v14, %v461_v37  ;;  %v827_v37 = vld [vmem:[%s1658_s5] sm:$0xff] }
  0xaf   : > { %v498_v34 = vpop.permute.xlu1 %497  ;;  %v1507_v42 = vpop.permute.xlu0 %587 }
  0xb0   : > { %v500_v63 = vsel %vm499_vm3, %v496_v32, %v498_v34  ;;  %v501_v0 = vsel %vm499_vm3, %v498_v34, %v496_v32  ;;  %v1153_v32 = vld [vmem:[%s1654_s1 + $0xe] sm:$0x3] }
  0xb1   : > { %v517_v12 = vmul.f32 %v510_v57, %v501_v0  ;;  %v518_v16 = vmul.f32 %v514_v58, %v500_v63  ;;  %v609_v44 = vrot.slane %v1153_v32, %v1488_v29 }
  0xb3   : > { %v529_v45 = vpop.permute.xlu1 %528  ;;  %v531_v56 = vpop.permute.xlu0 %530  ;;  %v524_v38 = vmul.f32 %v1482_v23, %v517_v12  ;;  %v525_v19 = vmul.f32 %v1482_v23, %v518_v16 }
  0xb4   : > { %v533_v17 = vsel %vm532_vm4, %v529_v45, %v531_v56  ;;  %v534_v18 = vsel %vm532_vm4, %v531_v56, %v529_v45  ;;  %v613_v45 = vrot.slane %v1153_v32, %v1490_v30 }
  0xb5   : > { %v550_v33 = vmul.f32 %v543_v59, %v533_v17  ;;  %v551_v34 = vmul.f32 %v547_v3, %v534_v18  ;;  %v526_v52 = vadd.f32 %v524_v38, %v493_v46  ;;  %v527_v53 = vadd.f32 %v525_v19, %v494_v47  ;;  %v668_v18 = vld [vmem:[%s1657_s4] sm:$0xff] }
  0xb7   : > { %v621_v60 = vpop.permute.xlu1 %620  ;;  %v562_v11 = vpop.permute.xlu0 %561  ;;  %v557_v48 = vmul.f32 %v1486_v28, %v550_v33  ;;  %v558_v49 = vmul.f32 %v1486_v28, %v551_v34  ;;  %v836_v33 = vld [vmem:[%s1659_s6] sm:$0xff]  ;;  %v849_v34 = vld [vmem:[%s1661_s8 + $0x8] sm:$0xff] }
  0xb9   : > { %v559_v28 = vadd.f32 %v557_v48, %v526_v52  ;;  %v560_v61 = vadd.f32 %v558_v49, %v527_v53 }
  0xbb   : > { %v564_v20 = vpop.permute.xlu1 %563  ;;  %v654_v35 = vpop.permute.xlu0 %653 }
  0xbc   : > { %v566_v27 = vsel %vm565_vm5, %v562_v11, %v564_v20  ;;  %v567_v31 = vsel %vm565_vm5, %v564_v20, %v562_v11 }
  0xbd   : > { %v583_v40 = vmul.f32 %v576_v24, %v566_v27  ;;  %v584_v41 = vmul.f32 %v580_v15, %v567_v31 }
  0xbf   : > { %v595_v43 = vpop.permute.xlu1 %594  ;;  %v597_v23 = vpop.permute.xlu0 %596  ;;  %v590_v56 = vmul.f32 %v1507_v42, %v583_v40  ;;  %v591_v57 = vmul.f32 %v1507_v42, %v584_v41  ;;  %v964_v40 = vld [vmem:[%s1663_s10] sm:$0xff] }
  0xc0   : > { %v599_v54 = vsel %vm598_vm6, %v595_v43, %v597_v23  ;;  %v600_v55 = vsel %vm598_vm6, %v597_v23, %v595_v43  ;;  %v846_v23 = vld [vmem:[%s1660_s7] sm:$0xff] }
  0xc1   : > { %v616_v58 = vmul.f32 %v609_v44, %v599_v54  ;;  %v617_v59 = vmul.f32 %v613_v45, %v600_v55  ;;  %v592_v2 = vadd.f32 %v590_v56, %v559_v28  ;;  %v593_v3 = vadd.f32 %v591_v57, %v560_v61 }
  0xc3   : > { %v623_v62 = vmul.f32 %v621_v60, %v616_v58  ;;  %v624_v29 = vmul.f32 %v621_v60, %v617_v59  ;;  %v628_v63 = vpop.permute.xlu1 %627  ;;  %v630_v30 = vpop.permute.xlu0 %629 }
  0xc4   : > { %v632_v0 = vsel %vm631_vm7, %v628_v63, %v630_v30  ;;  %v633_v1 = vsel %vm631_vm7, %v630_v30, %v628_v63 }
  0xc5   : > { %v649_v6 = vmul.f32 %v642_v50, %v632_v0  ;;  %v650_v7 = vmul.f32 %v646_v51, %v633_v1  ;;  %v626_v9 = vadd.f32 %v624_v29, %v593_v3  ;;  %v625_v10 = vadd.f32 %v623_v62, %v592_v2  ;;  %v847_v50 = vld [vmem:[%s1660_s7 + $0x8] sm:$0xff] }
  0xc7   : > { %v656_v8 = vmul.f32 %v654_v35, %v649_v6  ;;  %v657_v42 = vmul.f32 %v654_v35, %v650_v7  ;;  %v664_v16 = vpop.permute.xlu1 %663 }
  0xc9   : > { %v659_v11 = vadd.f32 %v657_v42, %v626_v9  ;;  %v658_v12 = vadd.f32 %v656_v8, %v625_v10 }
  0xcb   : > { %v667_v60 = vadd.f32 %v664_v16, %v659_v11  ;;  %v666_v17 = vadd.f32 %v664_v16, %v658_v12 }
  0xcd   : > { %673 = vmatprep.subr.mxu0 %v667_v60 }
  0xce   : > { %674 = vmatpush1.msra.mxu0 %v666_v17 }
  0xcf   : > { %1157 = vmatmul.mubr.msk.f32.vlgmr.msra.gmra.mrb[0].mxu0 %vm669_vm8, %v668_v18 }
  0xd0   : > { %930 = vmatprep.mubr.f32.mxu0 %v1311_v13 }
 0x1a2   : > { %v739_v26 = vpop.f32.mrb[0].mxu0 }
 0x1a3   : > { %v741_v20 = vpop.f32.mrb[1].mxu0 }
 0x1a4   : > { %v744_v21 = vadd.f32 %v741_v20, %v739_v26  ;;  %v963_v26 = vld [vmem:[%s1662_s9] sm:$0xff] }
 0x1a6   : > { %745 = vadd.xlane.f32.xlu0 %v744_v21 }
 0x233   : > { %v746_v22 = vpop.xlane.xlu0 %745 }
 0x234   : > { %v747_v24 = vsub.f32 %v666_v17, %v746_v22  ;;  %v748_v15 = vsub.f32 %v667_v60, %v746_v22 }
 0x236   : > { %v750_v25 = vmul.f32 %v748_v15, %v748_v15  ;;  %v749_v14 = vmul.f32 %v747_v24, %v747_v24 }
 0x238   : > { %751 = vmatprep.subr.mxu1 %v750_v25 }
 0x239   : > { %752 = vmatpush1.msra.mxu1 %v749_v14 }
 0x23a   : > { %1158 = vmatmul.mubr.msk.f32.vlgmr.msra.gmra.mrb[0].mxu1 %vm669_vm8, %v668_v18 }
 0x23b   : > { %1038 = vmatprep.mubr.f32.mxu1 %v1311_v13 }
 0x30d   : > { %v817_v27 = vpop.f32.mrb[0].mxu1 }
 0x30e   : > { %v819_v31 = vpop.f32.mrb[1].mxu1 }
 0x30f   : > { %v822_v32 = vadd.f32 %v819_v31, %v817_v27 }
 0x311   : > { %823 = vadd.xlane.f32.xlu1 %v822_v32 }
 0x322   : > { %839 = vperm.xlu1 %1223, %v836_v33  }
 0x326   : > { %857 = vperm.xlu1 %1223, %v849_v34  }
 0x39e   : > { %v824_v35 = vpop.xlane.xlu1 %823 }
 0x39f   : > { %v825_v36 = vadd.f32 1e-05, %v824_v35 }
 0x3a1   : > { %1224 = vrsqrt.f32 %v825_v36 }
 0x3a2   : > { %v840_v45 = vpop.permute.xlu1 %839 }
 0x3a6   : > { %v858_v57 = vpop.permute.xlu1 %857 }
 0x3ab   : > { %v1225_v38 = vpop.eup %1224 }
 0x3ac   : > { %v828_v19 = vmul.f32 %v1225_v38, %v827_v37 }
 0x3ae   : > { %831 = vperm.xlu0 %1222, %v828_v19  }
 0x3b2   : > { %852 = vperm.xlu0 %1222, %v848_v39  }
 0x3b6   : > { %967 = vperm.xlu0 %1222, %v964_v40  }
 0x42d   : > { %v832_v41 = vpop.permute.xlu0 %831 }
 0x42e   : > { %v834_v43 = vmul.f32 %v832_v41, %v747_v24  ;;  %v835_v44 = vmul.f32 %v832_v41, %v748_v15 }
 0x430   : > { %v842_v46 = vadd.f32 %v840_v45, %v834_v43  ;;  %v843_v47 = vadd.f32 %v840_v45, %v835_v44 }
 0x431   : > { %v853_v51 = vpop.permute.xlu0 %852 }
 0x432   : > { %v844_v48 = vmax.f32 %v842_v46, 0.0  ;;  %v845_v49 = vmax.f32 %v843_v47, 0.0 }
 0x434   : > { %866 = vmatprep.subr.mxu0 %v845_v49 }
 0x435   : > { %867 = vmatpush1.msra.mxu0 %v844_v48  ;;  %v968_v20 = vpop.permute.xlu0 %967 }
 0x436   : > { %1159 = vmatmul.mubr.msk.f32.vlgmr.msra.gmra.mrb[2].mxu0 %vm669_vm8, %v846_v23 }
 0x437   : > { %936 = vmatprep.mubr.f32.mxu0 %v1311_v13 }
 0x43a   : > { %1160 = vmatmul.mubr.msk.f32.gmra.mrb[4].mxu0 %vm669_vm8, %v847_v50 }
 0x509   : > { %v932_v52 = vpop.f32.mrb[2].mxu0 }
 0x50a   : > { %v933_v53 = vadd.f32 %v932_v52, %v853_v51  ;;  %v934_v54 = vpop.f32.mrb[3].mxu0 }
 0x50b   : > { %v935_v55 = vadd.f32 %v934_v54, %v853_v51 }
 0x50c   : > { %v947_v56 = vmul.f32 0.70710677, %v933_v53  ;;  %v943_v6 = vmul.f32 0.5, %v933_v53 }
 0x50d   : > { %v948_v58 = vmul.f32 0.70710677, %v935_v55  ;;  %v938_v59 = vpop.f32.mrb[4].mxu0  ;;  %v944_v42 = vmul.f32 0.5, %v935_v55 }
 0x50e   : > { %1226 = verf.f32 %v947_v56  ;;  %v939_v28 = vadd.f32 %v938_v59, %v858_v57  ;;  %v940_v61 = vpop.f32.mrb[5].mxu0 }
 0x50f   : > { %1228 = verf.f32 %v948_v58  ;;  %v941_v13 = vadd.f32 %v940_v61, %v858_v57 }
 0x510   : > { %v949_v62 = vmul.f32 0.70710677, %v939_v28  ;;  %v945_v7 = vmul.f32 0.5, %v939_v28 }
 0x511   : > { %v950_v29 = vmul.f32 0.70710677, %v941_v13  ;;  %v946_v9 = vmul.f32 0.5, %v941_v13 }
 0x512   : > { %1230 = verf.f32 %v949_v62 }
 0x513   : > { %1232 = verf.f32 %v950_v29 }
 0x518   : > { %v1227_v63 = vpop.eup %1226 }
 0x519   : > { %v1229_v30 = vpop.eup %1228  ;;  %v955_v0 = vadd.f32 1.0, %v1227_v63 }
 0x51a   : > { %v956_v2 = vadd.f32 1.0, %v1229_v30 }
 0x51b   : > { %v959_v11 = vmul.f32 %v955_v0, %v943_v6 }
 0x51c   : > { %v1231_v1 = vpop.eup %1230  ;;  %v960_v16 = vmul.f32 %v956_v2, %v944_v42 }
 0x51d   : > { %v1233_v3 = vpop.eup %1232  ;;  %v957_v8 = vadd.f32 1.0, %v1231_v1 }
 0x51e   : > { %v958_v10 = vadd.f32 1.0, %v1233_v3 }
 0x51f   : > { %v961_v12 = vmul.f32 %v957_v8, %v945_v7 }
 0x520   : > { %v962_v60 = vmul.f32 %v958_v10, %v946_v9 }
 0x521   : > { %v1171_v17 = vpack.c.bf16 %v961_v12, %v959_v11 }
 0x522   : > { %v1169_v18 = vpack.c.bf16 %v962_v60, %v960_v16 }
 0x524   : > { %1170 = vmatprep.subr.bf16.mxu1 %v1169_v18 }
 0x525   : > { %1172 = vmatpush1.bf16.msra.mxu1 %v1171_v17 }
 0x528   : > { %1161 = vmatmul.mubr.msk.f32.vlgmr.msra.gmra.mrb[2].mxu1 %vm970_vm9, %v963_v26 }
 0x5fb   : > { %v1040_v21 = vpop.f32.mrb[2].mxu1 }
 0x5fc   : > { %v1041_v22 = vadd.f32 %v1040_v21, %v968_v20  ;;  %v1042_v24 = vpop.f32.mrb[3].mxu1 }
 0x5fd   : > { %v1043_v15 = vadd.f32 %v1042_v24, %v968_v20 }
 0x5fe   : > { %v1047_v25 = vmul.f32 0.70710677, %v1041_v22  ;;  %v1045_v32 = vmul.f32 0.5, %v1041_v22 }
 0x5ff   : > { %v1048_v14 = vmul.f32 0.70710677, %v1043_v15  ;;  %v1046_v34 = vmul.f32 0.5, %v1043_v15 }
 0x600   : > { %1234 = verf.f32 %v1047_v25 }
 0x601   : > { %1236 = verf.f32 %v1048_v14 }
 0x60a   : > { %v1235_v27 = vpop.eup %1234 }
 0x60b   : > { %v1237_v31 = vpop.eup %1236  ;;  %v1051_v33 = vadd.f32 1.0, %v1235_v27 }
 0x60c   : > { %v1052_v35 = vadd.f32 1.0, %v1237_v31 }
 0x60d   : > { %v1053_v36 = vmul.f32 %v1051_v33, %v1045_v32 }
 0x60e   : > { %v1054_v37 = vmul.f32 %v1052_v35, %v1046_v34 }
 0x60f   : > { %v1055_v38 = vadd.f32 %v1053_v36, %v1435_v4 }
 0x610   : > { %v1056_v19 = vadd.f32 %v1054_v37, %v1438_v5 }
 0x611   : > { %v1057_v39 = vmax.f32 %v1055_v38, 0.0 }
 0x612   : > { %v1058_v40 = vmax.f32 %v1056_v19, 0.0 }
 0x613   : > { %1059 = vst [vmem:[%s379_s29] sm:$0xff] %v1057_v39 }
 0x614   : > { %1060 = vst [vmem:[%s379_s29 + $0x8] sm:$0xff] %v1058_v40 }
 0x615   : > { %1251 = shalt.err (!%p1248_p3)
}
 0x616   : > { %s1252_s22 = scalar_lea.hbm %s1611_s14, 256  ;;  %s1256_s12 = scalar_lea.hbm %s1664_s11, 512 }
 0x617   : > { %p1253_p4 = scmp.ne.s32.totalorder %s1611_s14, %s1252_s22  ;;  %p1257_p9 = scmp.lt.u32.totalorder %s1611_s14, %s1664_s11 }
 0x618   : > { %p1258_p10 = scmp.lt.u32.totalorder %s1256_s12, %s1252_s22  ;;  %p1260_p12 = scmp.lt.u32.totalorder %s1252_s22, %s1611_s14 }
 0x619   : > { %p1254_p7 = pnand %p1253_p4, %p1411_p5 }
 0x61a   : > { %p1259_p11 = por %p1258_p10, %p1257_p9 }
 0x61b   : > { %p1255_p8 = pneg %p1254_p7 }
 0x61c   : > { %p1261_p13 = por %p1260_p12, %p1259_p11 }
 0x61e   : > { %p1262_p0 = pnand %p1261_p13, %p1255_p8 }
 0x620   : > { %1265 = shalt.err (!%p1262_p0)
}
 0x621   : > { %1173 = dma.vmem_to_hbm [thread:$0]  (%p1411_p5), %s1613_s30, 256, %s1611_s14, %s1062_s15  }
 0x622 PF: > { %p1179_p1 = scmp.ge.s32.totalorder %s1300_s20, 2  ;;  %s1088_s0 = sand.u32 1, %s1288_s17  }
 0x623   : > { %s1089_s21 = scalar_lea.sflag [#allocation3], %s1088_s0 }
 0x624   : > { %p1176_p2 = pnand %p1179_p1, %p1415_p6 }
 0x626   : > { %1283 = dma.done.wait (!%p1176_p2), %s1089_s21, 256  }
 0x627   : > { %1285 = vsyncadd (!%p1176_p2), %s1089_s21, 4294967040  ;;  %p21_p3 = scmp.ge.s32.totalorder %s1398_s23, 4   ;;  %s1669_s17 = smov %s1292_s18 }
 0x628   : > { %s1670_s18 = smov %s1296_s19  ;;  %s1671_s19 = smov %s1409_s26 }
 0x629   : > { %s1672_s20 = smov %s1398_s23  ;;  %23 = sbr.rel (!%p21_p3) target bundleno = 5 (0x5), region = 114 }
 0x630   :  { %1094 = vsyncpa [#allocation3], 1 }
 0x631   :  { %1096 = vsyncpa [#allocation3 + $0x1], 1 }

</bundles_post_ra>
